<compile_context>
chip_gen: v5e
topology: v5e:2x2
jax: 0.10.0
libtpu: 0.0.40
codegen_flags: <defaults>
</compile_context>

<pallas_src>
import math

import jax
import jax.numpy as jnp
from jax.experimental import pallas as pl
from jax.experimental.pallas import tpu as pltpu


_LANE = 128      # lane width (last dim)
_SUBLANE = 8     # sublane width (second-to-last dim)


def _round_up(n, m):
    return ((n + m - 1) // m) * m


def _vmem_capacity_bytes():
    try:
        return int(pltpu.get_tpu_info().vmem_capacity_bytes)
    except Exception:
        return 64 * 1024 * 1024  # conservative (v7x per-TensorCore)


def _choose_batch_tile(batch, max_tile=256, min_programs=2):
    """Largest tile <= max_tile (multiple of 8) that gives >= min_programs grid
    steps when possible and keeps batch-padding waste small."""
    b8 = _round_up(max(batch, 1), _SUBLANE)
    if b8 <= _SUBLANE:
        return _SUBLANE
    tb = min(max_tile, _round_up(-(-b8 // min_programs), _SUBLANE))
    while tb > _SUBLANE:
        waste = _round_up(batch, tb) - batch
        if waste <= max(_SUBLANE, batch // 8):
            break
        tb -= _SUBLANE
    return tb


def _vmem_limit(weight_bytes, tb, gdims, out_itemsize, cap):
    """Footprint-derived, generation-aware VMEM limit (cap ~85% of physical)."""
    x_buf = 2 * tb * gdims[0] * 2               # bf16 input tile, double-buffered
    o_buf = 2 * tb * gdims[-1] * out_itemsize   # output tile, double-buffered
    act = 2 * tb * max(gdims) * 4               # widest f32 working activation (+slack)
    need = weight_bytes + x_buf + o_buf + act + (2 << 20)
    return min(int(cap * 0.85), max(16 << 20, 2 * need))


def _split_layer_groups(layer_bytes, budget):
    """Greedy contiguous grouping so each group's weights fit the VMEM budget."""
    groups, cur, cur_bytes = [], [], 0
    for i, nb in enumerate(layer_bytes):
        if cur and cur_bytes + nb > budget:
            groups.append(cur)
            cur, cur_bytes = [], 0
        cur.append(i)
        cur_bytes += nb
    groups.append(cur)
    return groups


# ----------------------------------------------------------------------------
# Fused Pallas kernel: a chain of Linear layers (+ ReLU where flagged)
# ----------------------------------------------------------------------------
def _make_mlp_kernel(relu_flags):
    n_layers = len(relu_flags)

    def kernel(*refs):
        x_ref = refs[0]
        o_ref = refs[-1]
        wb = refs[1:-1]

        h = x_ref[...]                                  # bf16 (TB, Dpad_in)
        for i in range(n_layers):
            w = wb[2 * i][...]                          # bf16 (Dpad_i, Dpad_{i+1})
            b = wb[2 * i + 1][...]                      # f32  (1, Dpad_{i+1})
            y = jnp.dot(h, w, preferred_element_type=jnp.float32)
            y = y + b                                   # f32 elementwise (v5e-safe)
            if relu_flags[i]:
                y = jnp.maximum(y, 0.0)
            # Keep inter-layer activation bf16; final layer stays f32 for the store.
            h = y.astype(jnp.bfloat16) if i + 1 < n_layers else y
        o_ref[...] = h.astype(o_ref.dtype)

    return kernel


def _run_group(xp, ws, bs, relu_flags, gdims, tb, out_dtype, cap):
    """One pallas_call over batch tiles for a contiguous group of layers."""
    b_pad = xp.shape[0]
    grid = (b_pad // tb,)
    n = len(ws)

    weight_bytes = sum(w.size * w.dtype.itemsize for w in ws) + \
                   sum(b.size * b.dtype.itemsize for b in bs)
    out_itemsize = jnp.dtype(out_dtype).itemsize
    vmem_limit = _vmem_limit(weight_bytes, tb, gdims, out_itemsize, cap)

    flops = 2 * b_pad * sum(gdims[i] * gdims[i + 1] for i in range(n))
    bytes_accessed = (xp.size * xp.dtype.itemsize + weight_bytes
                      + b_pad * gdims[-1] * out_itemsize)

    kernel = _make_mlp_kernel(relu_flags)

    def call(single_buffer_consts):
        # Constant (grid-invariant) operands: weights/biases. Single-buffer them so
        # they are not needlessly double-buffered in VMEM.
        const_kw = {"pipeline_mode": pl.Buffered(1)} if single_buffer_consts else {}
        in_specs = [pl.BlockSpec((tb, gdims[0]), lambda g: (g, 0))]
        for i in range(n):
            in_specs.append(
                pl.BlockSpec((gdims[i], gdims[i + 1]), lambda g: (0, 0), **const_kw))
            in_specs.append(
                pl.BlockSpec((1, gdims[i + 1]), lambda g: (0, 0), **const_kw))
        out_spec = pl.BlockSpec((tb, gdims[-1]), lambda g: (g, 0))

        return pl.pallas_call(
            kernel,
            out_shape=jax.ShapeDtypeStruct((b_pad, gdims[-1]), out_dtype),
            grid=grid,
            in_specs=in_specs,
            out_specs=out_spec,
            compiler_params=pltpu.CompilerParams(
                dimension_semantics=("parallel",),
                vmem_limit_bytes=vmem_limit,
            ),
            cost_estimate=pl.CostEstimate(
                flops=flops, transcendentals=0, bytes_accessed=bytes_accessed),
        )(xp, *[t for pair in zip(ws, bs) for t in pair])

    try:
        return call(True)
    except Exception:
        # Fallback for JAX builds where BlockSpec pipeline_mode / Buffered(1) is
        # unsupported: default double-buffered constant operands.
        return call(False)


# ----------------------------------------------------------------------------
# One-time parameter preparation (padding + bf16 cast hoisted out of the forward)
# ----------------------------------------------------------------------------
def prepare_mlp_params(params, input_d):
    """params = [(w_i, b_i)], w_i: (d_in, d_out), b_i: (d_out,). Pads feature dims
    to lane multiples (zero padding keeps the math exact) and casts weights to bf16."""
    n_layers = len(params)
    dims = [input_d] + [w.shape[1] for w, _ in params]
    pdims = [_round_up(d, _LANE) for d in dims]

    weights, biases = [], []
    for i, (w, b) in enumerate(params):
        pw = jnp.zeros((pdims[i], pdims[i + 1]), jnp.bfloat16)
        pw = pw.at[: w.shape[0], : w.shape[1]].set(w.astype(jnp.bfloat16))
        pb = jnp.zeros((1, pdims[i + 1]), jnp.float32)
        pb = pb.at[:, : b.shape[0]].set(b.astype(jnp.float32).reshape(1, -1))
        weights.append(pw)
        biases.append(pb)

    # ReLU only after "inner" hidden Linears (indices 1 .. n_layers-2): matches PyTorch.
    relu_flags = tuple(1 <= i <= n_layers - 2 for i in range(n_layers))
    return dict(pdims=pdims, weights=weights, biases=biases,
                relu_flags=relu_flags, d_in=input_d, d_out=dims[-1])


# ----------------------------------------------------------------------------
# Forward pass
# ----------------------------------------------------------------------------
def mlp_forward(prepared, x, *, out_dtype=None, max_batch_tile=256):
    pdims = prepared["pdims"]
    ws, bs = prepared["weights"], prepared["biases"]
    relu_flags = prepared["relu_flags"]
    d_in, d_out = prepared["d_in"], prepared["d_out"]
    batch = x.shape[0]
    out_dtype = x.dtype if out_dtype is None else out_dtype

    tb = _choose_batch_tile(batch, max_batch_tile)
    b_pad = _round_up(batch, tb)

    # Stream the input as bf16 (lane-dense, zero-padded -> exact math).
    h = jnp.zeros((b_pad, pdims[0]), jnp.bfloat16)
    h = h.at[:batch, :d_in].set(x.astype(jnp.bfloat16))

    cap = _vmem_capacity_bytes()
    layer_bytes = [ws[i].size * ws[i].dtype.itemsize + bs[i].size * bs[i].dtype.itemsize
                   for i in range(len(ws))]
    groups = _split_layer_groups(layer_bytes, max(int(cap * 0.45), 1 << 20))

    for gi, g in enumerate(groups):
        last = gi == len(groups) - 1
        g_out_dtype = out_dtype if last else jnp.bfloat16
        gdims = [pdims[g[0]]] + [pdims[i + 1] for i in g]
        h = _run_group(h,
                       [ws[i] for i in g], [bs[i] for i in g],
                       tuple(relu_flags[i] for i in g),
                       gdims, tb, g_out_dtype, cap)

    return h[:batch, :d_out]


# ----------------------------------------------------------------------------
# Parameter init mimicking PyTorch nn.Linear default (uniform +/- 1/sqrt(fan_in)).
# Weights stored already transposed: (in_features, out_features).
# ----------------------------------------------------------------------------
def init_mlp_params(key, input_d, hidden_d, output_d=1, dtype=jnp.float32):
    dims = [input_d] + list(hidden_d) + [output_d]
    params = []
    for i in range(len(dims) - 1):
        d_i, d_o = dims[i], dims[i + 1]
        key, kw, kb = jax.random.split(key, 3)
        bound = 1.0 / math.sqrt(d_i)
        w = jax.random.uniform(kw, (d_i, d_o), dtype=dtype, minval=-bound, maxval=bound)
        b = jax.random.uniform(kb, (d_o,), dtype=dtype, minval=-bound, maxval=bound)
        params.append((w, b))
    return params


# ----------------------------------------------------------------------------
# Pure-JAX reference with matching numerics (bf16 operands, f32 accumulation)
# ----------------------------------------------------------------------------
def mlp_reference(params, x):
    n_layers = len(params)
    h = x.astype(jnp.float32)
    for i, (w, b) in enumerate(params):
        y = jnp.dot(h.astype(jnp.bfloat16), w.astype(jnp.bfloat16),
                    preferred_element_type=jnp.float32) + b.astype(jnp.float32)
        if 1 <= i <= n_layers - 2:
            y = jnp.maximum(y, 0.0)
        h = y
    return h


if __name__ == "__main__":
    key = jax.random.PRNGKey(0)

    # Small shapes consistent with the module: MLP(input_d=16, hidden_d=[32, 32], output_d=1)
    batch = 8
    input_d = 16
    hidden_d = [32, 32]
    output_d = 1

    key, kx, kp = jax.random.split(key, 3)
    x = jax.random.normal(kx, (batch, input_d), dtype=jnp.float32)
    params = init_mlp_params(kp, input_d, hidden_d, output_d)

    prepared = prepare_mlp_params(params, input_d)   # padding / bf16 cast done once
    out = mlp_forward(prepared, x)
    out = jax.block_until_ready(out)

    ref = mlp_reference(params, x)
    assert out.shape == (batch, output_d), out.shape
    assert jnp.allclose(out, ref, atol=1e-3, rtol=1e-2), (out, ref)

    print("KERNEL_OK")
</pallas_src>

<mosaic_0001>
module attributes {stable_mosaic.version = 11 : i64} {
  func.func @kernel(%arg0: i32, %arg1: memref<8x128xbf16, #tpu.memory_space<vmem>>, %arg2: memref<128x128xbf16, #tpu.memory_space<vmem>>, %arg3: memref<1x128xf32, #tpu.memory_space<vmem>>, %arg4: memref<128x128xbf16, #tpu.memory_space<vmem>>, %arg5: memref<1x128xf32, #tpu.memory_space<vmem>>, %arg6: memref<128x128xbf16, #tpu.memory_space<vmem>>, %arg7: memref<1x128xf32, #tpu.memory_space<vmem>>, %arg8: memref<8x128xf32, #tpu.memory_space<vmem>>) attributes {dimension_semantics = [#tpu.dimension_semantics<parallel>], iteration_bounds = array<i64: 1>, scalar_prefetch = 0 : i64, scratch_operands = 0 : i64, tpu.core_type = #tpu.core_type<tc>, window_params = [{transform_indices = @transform_0, window_bounds = array<i64: 8, 128>}, {pipeline_mode = #tpu.pipeline_mode<synchronous>, transform_indices = @transform_1, window_bounds = array<i64: 128, 128>}, {pipeline_mode = #tpu.pipeline_mode<synchronous>, transform_indices = @transform_2, window_bounds = array<i64: 1, 128>}, {pipeline_mode = #tpu.pipeline_mode<synchronous>, transform_indices = @transform_3, window_bounds = array<i64: 128, 128>}, {pipeline_mode = #tpu.pipeline_mode<synchronous>, transform_indices = @transform_4, window_bounds = array<i64: 1, 128>}, {pipeline_mode = #tpu.pipeline_mode<synchronous>, transform_indices = @transform_5, window_bounds = array<i64: 128, 128>}, {pipeline_mode = #tpu.pipeline_mode<synchronous>, transform_indices = @transform_6, window_bounds = array<i64: 1, 128>}, {transform_indices = @transform_7, window_bounds = array<i64: 8, 128>}]} {
    %c0 = arith.constant 0 : index
    %c0_0 = arith.constant 0 : index
    %0 = vector.load %arg1[%c0, %c0_0] : memref<8x128xbf16, #tpu.memory_space<vmem>>, vector<8x128xbf16>
    %c0_1 = arith.constant 0 : index
    %c0_2 = arith.constant 0 : index
    %1 = vector.load %arg2[%c0_1, %c0_2] : memref<128x128xbf16, #tpu.memory_space<vmem>>, vector<128x128xbf16>
    %c0_3 = arith.constant 0 : index
    %c0_4 = arith.constant 0 : index
    %2 = vector.load %arg3[%c0_3, %c0_4] : memref<1x128xf32, #tpu.memory_space<vmem>>, vector<1x128xf32>
    %cst = arith.constant dense<0.000000e+00> : vector<8x128xf32>
    %3 = tpu.matmul %0, %1, %cst {dimension_numbers = #tpu.dot_dimension_numbers<[1], [0], [0], [1], [0, 0, 1, 1], [], []>} : vector<8x128xbf16>, vector<128x128xbf16>, vector<8x128xf32> -> vector<8x128xf32>
    %4 = vector.broadcast %2 : vector<1x128xf32> to vector<8x128xf32>
    %5 = arith.addf %3, %4 : vector<8x128xf32>
    %6 = arith.truncf %5 : vector<8x128xf32> to vector<8x128xbf16>
    %c0_5 = arith.constant 0 : index
    %c0_6 = arith.constant 0 : index
    %7 = vector.load %arg4[%c0_5, %c0_6] : memref<128x128xbf16, #tpu.memory_space<vmem>>, vector<128x128xbf16>
    %c0_7 = arith.constant 0 : index
    %c0_8 = arith.constant 0 : index
    %8 = vector.load %arg5[%c0_7, %c0_8] : memref<1x128xf32, #tpu.memory_space<vmem>>, vector<1x128xf32>
    %cst_9 = arith.constant dense<0.000000e+00> : vector<8x128xf32>
    %9 = tpu.matmul %6, %7, %cst_9 {dimension_numbers = #tpu.dot_dimension_numbers<[1], [0], [0], [1], [0, 0, 1, 1], [], []>} : vector<8x128xbf16>, vector<128x128xbf16>, vector<8x128xf32> -> vector<8x128xf32>
    %10 = vector.broadcast %8 : vector<1x128xf32> to vector<8x128xf32>
    %11 = arith.addf %9, %10 : vector<8x128xf32>
    %cst_10 = arith.constant 0.000000e+00 : f32
    %12 = vector.broadcast %cst_10 : f32 to vector<8x128xf32>
    %13 = arith.maximumf %11, %12 : vector<8x128xf32>
    %14 = arith.truncf %13 : vector<8x128xf32> to vector<8x128xbf16>
    %c0_11 = arith.constant 0 : index
    %c0_12 = arith.constant 0 : index
    %15 = vector.load %arg6[%c0_11, %c0_12] : memref<128x128xbf16, #tpu.memory_space<vmem>>, vector<128x128xbf16>
    %c0_13 = arith.constant 0 : index
    %c0_14 = arith.constant 0 : index
    %16 = vector.load %arg7[%c0_13, %c0_14] : memref<1x128xf32, #tpu.memory_space<vmem>>, vector<1x128xf32>
    %cst_15 = arith.constant dense<0.000000e+00> : vector<8x128xf32>
    %17 = tpu.matmul %14, %15, %cst_15 {dimension_numbers = #tpu.dot_dimension_numbers<[1], [0], [0], [1], [0, 0, 1, 1], [], []>} : vector<8x128xbf16>, vector<128x128xbf16>, vector<8x128xf32> -> vector<8x128xf32>
    %18 = vector.broadcast %16 : vector<1x128xf32> to vector<8x128xf32>
    %19 = arith.addf %17, %18 : vector<8x128xf32>
    %c0_16 = arith.constant 0 : index
    %c0_17 = arith.constant 0 : index
    %20 = vector.load %arg8[%c0_16, %c0_17] : memref<8x128xf32, #tpu.memory_space<vmem>>, vector<8x128xf32>
    tpu.vector_store %arg8[%c0_16, %c0_17], %19 {strides = array<i32>} : memref<8x128xf32, #tpu.memory_space<vmem>>, vector<8x128xf32>,
    return
  }
  func.func @transform_0(%arg0: i32) -> (i32, i32) {
    %c0_i32 = arith.constant 0 : i32
    %c0_i32_0 = arith.constant 0 : i32
    return %arg0, %c0_i32 : i32, i32
  }
  func.func @transform_1(%arg0: i32) -> (i32, i32) {
    %c0_i32 = arith.constant 0 : i32
    %c0_i32_0 = arith.constant 0 : i32
    %c0_i32_1 = arith.constant 0 : i32
    return %c0_i32, %c0_i32_0 : i32, i32
  }
  func.func @transform_2(%arg0: i32) -> (i32, i32) {
    %c0_i32 = arith.constant 0 : i32
    %c0_i32_0 = arith.constant 0 : i32
    %c0_i32_1 = arith.constant 0 : i32
    return %c0_i32, %c0_i32_0 : i32, i32
  }
  func.func @transform_3(%arg0: i32) -> (i32, i32) {
    %c0_i32 = arith.constant 0 : i32
    %c0_i32_0 = arith.constant 0 : i32
    %c0_i32_1 = arith.constant 0 : i32
    return %c0_i32, %c0_i32_0 : i32, i32
  }
  func.func @transform_4(%arg0: i32) -> (i32, i32) {
    %c0_i32 = arith.constant 0 : i32
    %c0_i32_0 = arith.constant 0 : i32
    %c0_i32_1 = arith.constant 0 : i32
    return %c0_i32, %c0_i32_0 : i32, i32
  }
  func.func @transform_5(%arg0: i32) -> (i32, i32) {
    %c0_i32 = arith.constant 0 : i32
    %c0_i32_0 = arith.constant 0 : i32
    %c0_i32_1 = arith.constant 0 : i32
    return %c0_i32, %c0_i32_0 : i32, i32
  }
  func.func @transform_6(%arg0: i32) -> (i32, i32) {
    %c0_i32 = arith.constant 0 : i32
    %c0_i32_0 = arith.constant 0 : i32
    %c0_i32_1 = arith.constant 0 : i32
    return %c0_i32, %c0_i32_0 : i32, i32
  }
  func.func @transform_7(%arg0: i32) -> (i32, i32) {
    %c0_i32 = arith.constant 0 : i32
    %c0_i32_0 = arith.constant 0 : i32
    return %arg0, %c0_i32 : i32, i32
  }
}

module attributes {stable_mosaic.version = 11 : i64} {
  func.func @kernel(%arg0: i32, %arg1: memref<8x128xbf16, #tpu.memory_space<vmem>>, %arg2: memref<128x128xbf16, #tpu.memory_space<vmem>>, %arg3: memref<1x128xf32, #tpu.memory_space<vmem>>, %arg4: memref<128x128xbf16, #tpu.memory_space<vmem>>, %arg5: memref<1x128xf32, #tpu.memory_space<vmem>>, %arg6: memref<128x128xbf16, #tpu.memory_space<vmem>>, %arg7: memref<1x128xf32, #tpu.memory_space<vmem>>, %arg8: memref<8x128xf32, #tpu.memory_space<vmem>>) attributes {dimension_semantics = [#tpu.dimension_semantics<parallel>], iteration_bounds = array<i64: 1>, scalar_prefetch = 0 : i64, scratch_operands = 0 : i64, tpu.core_type = #tpu.core_type<tc>, window_params = [{transform_indices = @transform_0, window_bounds = array<i64: 8, 128>}, {pipeline_mode = #tpu.pipeline_mode<synchronous>, transform_indices = @transform_1, window_bounds = array<i64: 128, 128>}, {pipeline_mode = #tpu.pipeline_mode<synchronous>, transform_indices = @transform_2, window_bounds = array<i64: 1, 128>}, {pipeline_mode = #tpu.pipeline_mode<synchronous>, transform_indices = @transform_3, window_bounds = array<i64: 128, 128>}, {pipeline_mode = #tpu.pipeline_mode<synchronous>, transform_indices = @transform_4, window_bounds = array<i64: 1, 128>}, {pipeline_mode = #tpu.pipeline_mode<synchronous>, transform_indices = @transform_5, window_bounds = array<i64: 128, 128>}, {pipeline_mode = #tpu.pipeline_mode<synchronous>, transform_indices = @transform_6, window_bounds = array<i64: 1, 128>}, {transform_indices = @transform_7, window_bounds = array<i64: 8, 128>}]} {
    %c0 = arith.constant 0 : index
    %c0_0 = arith.constant 0 : index
    %0 = vector.load %arg1[%c0, %c0_0] : memref<8x128xbf16, #tpu.memory_space<vmem>>, vector<8x128xbf16>
    %c0_1 = arith.constant 0 : index
    %c0_2 = arith.constant 0 : index
    %1 = vector.load %arg2[%c0_1, %c0_2] : memref<128x128xbf16, #tpu.memory_space<vmem>>, vector<128x128xbf16>
    %c0_3 = arith.constant 0 : index
    %c0_4 = arith.constant 0 : index
    %2 = vector.load %arg3[%c0_3, %c0_4] : memref<1x128xf32, #tpu.memory_space<vmem>>, vector<1x128xf32>
    %cst = arith.constant dense<0.000000e+00> : vector<8x128xf32>
    %3 = tpu.matmul %0, %1, %cst {dimension_numbers = #tpu.dot_dimension_numbers<[1], [0], [0], [1], [0, 0, 1, 1], [], []>} : vector<8x128xbf16>, vector<128x128xbf16>, vector<8x128xf32> -> vector<8x128xf32>
    %4 = vector.broadcast %2 : vector<1x128xf32> to vector<8x128xf32>
    %5 = arith.addf %3, %4 : vector<8x128xf32>
    %6 = arith.truncf %5 : vector<8x128xf32> to vector<8x128xbf16>
    %c0_5 = arith.constant 0 : index
    %c0_6 = arith.constant 0 : index
    %7 = vector.load %arg4[%c0_5, %c0_6] : memref<128x128xbf16, #tpu.memory_space<vmem>>, vector<128x128xbf16>
    %c0_7 = arith.constant 0 : index
    %c0_8 = arith.constant 0 : index
    %8 = vector.load %arg5[%c0_7, %c0_8] : memref<1x128xf32, #tpu.memory_space<vmem>>, vector<1x128xf32>
    %cst_9 = arith.constant dense<0.000000e+00> : vector<8x128xf32>
    %9 = tpu.matmul %6, %7, %cst_9 {dimension_numbers = #tpu.dot_dimension_numbers<[1], [0], [0], [1], [0, 0, 1, 1], [], []>} : vector<8x128xbf16>, vector<128x128xbf16>, vector<8x128xf32> -> vector<8x128xf32>
    %10 = vector.broadcast %8 : vector<1x128xf32> to vector<8x128xf32>
    %11 = arith.addf %9, %10 : vector<8x128xf32>
    %cst_10 = arith.constant 0.000000e+00 : f32
    %12 = vector.broadcast %cst_10 : f32 to vector<8x128xf32>
    %13 = arith.maximumf %11, %12 : vector<8x128xf32>
    %14 = arith.truncf %13 : vector<8x128xf32> to vector<8x128xbf16>
    %c0_11 = arith.constant 0 : index
    %c0_12 = arith.constant 0 : index
    %15 = vector.load %arg6[%c0_11, %c0_12] : memref<128x128xbf16, #tpu.memory_space<vmem>>, vector<128x128xbf16>
    %c0_13 = arith.constant 0 : index
    %c0_14 = arith.constant 0 : index
    %16 = vector.load %arg7[%c0_13, %c0_14] : memref<1x128xf32, #tpu.memory_space<vmem>>, vector<1x128xf32>
    %cst_15 = arith.constant dense<0.000000e+00> : vector<8x128xf32>
    %17 = tpu.matmul %14, %15, %cst_15 {dimension_numbers = #tpu.dot_dimension_numbers<[1], [0], [0], [1], [0, 0, 1, 1], [], []>} : vector<8x128xbf16>, vector<128x128xbf16>, vector<8x128xf32> -> vector<8x128xf32>
    %18 = vector.broadcast %16 : vector<1x128xf32> to vector<8x128xf32>
    %19 = arith.addf %17, %18 : vector<8x128xf32>
    %c0_16 = arith.constant 0 : index
    %c0_17 = arith.constant 0 : index
    %20 = vector.load %arg8[%c0_16, %c0_17] : memref<8x128xf32, #tpu.memory_space<vmem>>, vector<8x128xf32>
    tpu.vector_store %arg8[%c0_16, %c0_17], %19 {strides = array<i32>} : memref<8x128xf32, #tpu.memory_space<vmem>>, vector<8x128xf32>,
    return
  }
  func.func @transform_0(%arg0: i32) -> (i32, i32) {
    %c0_i32 = arith.constant 0 : i32
    %c0_i32_0 = arith.constant 0 : i32
    return %arg0, %c0_i32 : i32, i32
  }
  func.func @transform_1(%arg0: i32) -> (i32, i32) {
    %c0_i32 = arith.constant 0 : i32
    %c0_i32_0 = arith.constant 0 : i32
    %c0_i32_1 = arith.constant 0 : i32
    return %c0_i32, %c0_i32_0 : i32, i32
  }
  func.func @transform_2(%arg0: i32) -> (i32, i32) {
    %c0_i32 = arith.constant 0 : i32
    %c0_i32_0 = arith.constant 0 : i32
    %c0_i32_1 = arith.constant 0 : i32
    return %c0_i32, %c0_i32_0 : i32, i32
  }
  func.func @transform_3(%arg0: i32) -> (i32, i32) {
    %c0_i32 = arith.constant 0 : i32
    %c0_i32_0 = arith.constant 0 : i32
    %c0_i32_1 = arith.constant 0 : i32
    return %c0_i32, %c0_i32_0 : i32, i32
  }
  func.func @transform_4(%arg0: i32) -> (i32, i32) {
    %c0_i32 = arith.constant 0 : i32
    %c0_i32_0 = arith.constant 0 : i32
    %c0_i32_1 = arith.constant 0 : i32
    return %c0_i32, %c0_i32_0 : i32, i32
  }
  func.func @transform_5(%arg0: i32) -> (i32, i32) {
    %c0_i32 = arith.constant 0 : i32
    %c0_i32_0 = arith.constant 0 : i32
    %c0_i32_1 = arith.constant 0 : i32
    return %c0_i32, %c0_i32_0 : i32, i32
  }
  func.func @transform_6(%arg0: i32) -> (i32, i32) {
    %c0_i32 = arith.constant 0 : i32
    %c0_i32_0 = arith.constant 0 : i32
    %c0_i32_1 = arith.constant 0 : i32
    return %c0_i32, %c0_i32_0 : i32, i32
  }
  func.func @transform_7(%arg0: i32) -> (i32, i32) {
    %c0_i32 = arith.constant 0 : i32
    %c0_i32_0 = arith.constant 0 : i32
    return %arg0, %c0_i32 : i32, i32
  }
}

</mosaic_0001>

<bundles_post_ra>
// kernel: tpu_custom_call.1
= control target key start
LH: loop header
LB: loop body
LE: loop exit
PB: predicated region body
PF: predicated region fallthrough
CT: control target
= control target key end

     0   :  { %12 = vsyncpa [#allocation3], 0  ;;  %s684_s0 = inlined_call_operand.hbm [shape: bf16[8,128], index: 0, kind: input, shape index: {}]   ;;  %s685_s1 = inlined_call_operand.hbm [shape: bf16[128,128], index: 1, kind: input, shape index: {}]   ;;  %s686_s2 = inlined_call_operand.vmem [shape: f32[1,128], index: 2, kind: input, shape index: {}]   ;;  %s687_s3 = inlined_call_operand.hbm [shape: bf16[128,128], index: 3, kind: input, shape index: {}]   ;;  %s688_s4 = inlined_call_operand.vmem [shape: f32[1,128], index: 4, kind: input, shape index: {}]   ;;  %s689_s5 = inlined_call_operand.hbm [shape: bf16[128,128], index: 5, kind: input, shape index: {}]   ;;  %s690_s6 = inlined_call_operand.vmem [shape: f32[1,128], index: 6, kind: input, shape index: {}]   ;;  %s691_s7 = inlined_call_operand.hbm [shape: f32[8,128], index: 7, kind: output, shape index: {}]  }
   0x1   :  { %13 = vsyncpa [#allocation6], 0 }
   0x2   :  { %14 = vsyncpa [#allocation9], 0  ;;  %s31_s26 = sshll.u32 %s685_s1, 4  ;;  %s32_s26 = int_to_ptr.hbm [resolvable:$true] %s31_s26 }
   0x3   :  { %15 = vsyncpa [#allocation4], 0  ;;  %s613_s27 = smov [#allocation5]   ;;  %s21_s8 = sshll.u32 %s684_s0, 4  ;;  %s22_s8 = int_to_ptr.hbm [resolvable:$true] %s21_s8 }
   0x4   :  { %s33_s28 = sshll.u32 %s613_s27, 4  ;;  %s614_s9 = smov 64   ;;  %s34_s28 = int_to_ptr.vmem [resolvable:$true] %s33_s28 }
   0x5   :  { %s615_s10 = smov 4   ;;  %s616_s11 = smov [#allocation2]  }
   0x6   :  { %39 = dma.hbm_to_vmem [thread:$0]  %s32_s26, 1024, %s34_s28, [#allocation6], %s614_s9, %s614_s9, %s615_s10  }
   0x7   :  { %s23_s12 = sshll.u32 %s616_s11, 4  ;;  %s46_s15 = sshll.u32 %s687_s3, 4  ;;  %s24_s12 = int_to_ptr.vmem [resolvable:$true] %s23_s12  ;;  %s47_s15 = int_to_ptr.hbm [resolvable:$true] %s46_s15 }
   0x8   :  { %26 = dma.hbm_to_vmem [thread:$0]  %s22_s8, 64, %s24_s12, [#allocation3]  }
   0x9   :  { %s61_s17 = sshll.u32 %s689_s5, 4  ;;  %s617_s18 = smov [#allocation7]   ;;  %s62_s17 = int_to_ptr.hbm [resolvable:$true] %s61_s17 }
   0xa   :  { %s48_s19 = sshll.u32 %s617_s18, 4  ;;  %s618_s0 = smov [#allocation8]   ;;  %s49_s19 = int_to_ptr.vmem [resolvable:$true] %s48_s19 }
   0xb   :  { %54 = dma.hbm_to_vmem [thread:$0]  %s47_s15, 1024, %s49_s19, [#allocation6], %s614_s9, %s614_s9, %s615_s10  }
   0xc   :  { %s63_s20 = sshll.u32 %s618_s0, 4  ;;  %s64_s20 = int_to_ptr.vmem [resolvable:$true] %s63_s20 }
   0xd   :  { %69 = dma.hbm_to_vmem [thread:$0]  %s62_s17, 1024, %s64_s20, [#allocation9], %s614_s9, %s614_s9, %s615_s10  }
   0xe   :  { %605 = dma.done.wait [#allocation3], 64  }
   0xf   :  { %606 = vsyncadd [#allocation3], 4294967232 }
  0x10   :  { %607 = dma.done.wait [#allocation6], 2048  }
  0x11   :  { %608 = vsyncadd [#allocation6], 4294965248 }
  0x12   :  { %609 = dma.done.wait [#allocation9], 1024  }
  0x13   :  { %610 = vsyncadd [#allocation9], 4294966272  ;;  %v458_v0 = vld [vmem:[#allocation5 + $0x38] sm:$0xff]  ;;  %v457_v1 = vld [vmem:[#allocation5 + $0x30] sm:$0xff]  ;;  %s619_s24 = smov [#allocation10]   ;;  %s343_s28 = sshll.u32 %s691_s7, 4  ;;  %s344_s28 = int_to_ptr.hbm [resolvable:$true] %s343_s28 }
  0x14   :  { %157 = vmatpush.bf16.msra.mxu0 %v458_v0  ;;  %v466_v2 = vld [vmem:[#allocation7 + $0x38] sm:$0xff]  ;;  %v465_v3 = vld [vmem:[#allocation7 + $0x30] sm:$0xff]  ;;  %v456_v4 = vld [vmem:[#allocation5 + $0x28] sm:$0xff]  ;;  %s341_s25 = sshll.u32 %s619_s24, 4  ;;  %s342_s25 = int_to_ptr.vmem [resolvable:$true] %s341_s25 }
  0x15   :  { %239 = vmatpush.bf16.msra.mxu1 %v466_v2  ;;  %v464_v5 = vld [vmem:[#allocation7 + $0x28] sm:$0xff]  ;;  %v455_v6 = vld [vmem:[#allocation5 + $0x20] sm:$0xff]  ;;  %v454_v8 = vld [vmem:[#allocation5 + $0x18] sm:$0xff] }
  0x16   :  { %v463_v7 = vld [vmem:[#allocation7 + $0x20] sm:$0xff]  ;;  %v462_v9 = vld [vmem:[#allocation7 + $0x18] sm:$0xff]  ;;  %v453_v10 = vld [vmem:[#allocation5 + $0x10] sm:$0xff] }
  0x17   :  { %v461_v11 = vld [vmem:[#allocation7 + $0x10] sm:$0xff]  ;;  %v452_v12 = vld [vmem:[#allocation5 + $0x8] sm:$0xff]  ;;  %v451_v14 = vld [vmem:[#allocation5] sm:$0xff] }
  0x18   :  { %158 = vmatpush.bf16.msra.mxu0 %v457_v1  ;;  %v460_v13 = vld [vmem:[#allocation7 + $0x8] sm:$0xff]  ;;  %v88_v15 = vld [vmem:[#allocation2] sm:$0xf]  ;;  %v459_v16 = vld [vmem:[#allocation7] sm:$0xff] }
  0x19   :  { %240 = vmatpush.bf16.msra.mxu1 %v465_v3  ;;  %v474_v17 = vld [vmem:[#allocation8 + $0x38] sm:$0xff]  ;;  %v473_v18 = vld [vmem:[#allocation8 + $0x30] sm:$0xff]  ;;  %v472_v19 = vld [vmem:[#allocation8 + $0x28] sm:$0xff] }
  0x1a   :  { %322 = vmatpush.bf16.msra.mxu2 %v474_v17  ;;  %v471_v20 = vld [vmem:[#allocation8 + $0x20] sm:$0xff]  ;;  %v470_v21 = vld [vmem:[#allocation8 + $0x18] sm:$0xff]  ;;  %v469_v22 = vld [vmem:[#allocation8 + $0x10] sm:$0xff] }
  0x1b   :  { %v482_v23 = vld [vmem:[%s686_s2] ss:$0 sm:$0xff]  ;;  %v468_v28 = vld [vmem:[#allocation8 + $0x8] sm:$0xff]  ;;  %v467_v29 = vld [vmem:[#allocation8] sm:$0xff] }
  0x1c   :  { %159 = vmatpush.bf16.msra.mxu0 %v456_v4  ;;  %v483_v30 = vld [vmem:[%s688_s4] ss:$0 sm:$0xff] }
  0x1d   :  { %241 = vmatpush.bf16.msra.mxu1 %v464_v5  ;;  %v484_v36 = vld [vmem:[%s690_s6] ss:$0 sm:$0xff] }
  0x1e   :  { %323 = vmatpush.bf16.msra.mxu2 %v473_v18 }
  0x20   :  { %160 = vmatpush.bf16.msra.mxu0 %v455_v6 }
  0x21   :  { %242 = vmatpush.bf16.msra.mxu1 %v463_v7 }
  0x22   :  { %324 = vmatpush.bf16.msra.mxu2 %v472_v19 }
  0x24   :  { %161 = vmatpush.bf16.msra.mxu0 %v454_v8 }
  0x25   :  { %243 = vmatpush.bf16.msra.mxu1 %v462_v9 }
  0x26   :  { %325 = vmatpush.bf16.msra.mxu2 %v471_v20 }
  0x28   :  { %162 = vmatpush.bf16.msra.mxu0 %v453_v10 }
  0x29   :  { %244 = vmatpush.bf16.msra.mxu1 %v461_v11 }
  0x2a   :  { %326 = vmatpush.bf16.msra.mxu2 %v470_v21 }
  0x2c   :  { %163 = vmatpush.bf16.msra.mxu0 %v452_v12 }
  0x2d   :  { %245 = vmatpush.bf16.msra.mxu1 %v460_v13 }
  0x2e   :  { %327 = vmatpush.bf16.msra.mxu2 %v469_v22 }
  0x30   :  { %164 = vmatpush.bf16.msra.mxu0 %v451_v14 }
  0x31   :  { %246 = vmatpush.bf16.msra.mxu1 %v459_v16 }
  0x32   :  { %328 = vmatpush.bf16.msra.mxu2 %v468_v28 }
  0x33   :  { %165 = vmatmul.bf16.vlgmr.msra.gmra.mxu0 %v88_v15 }
  0x36   :  { %329 = vmatpush.bf16.msra.mxu2 %v467_v29 }
  0xb0   :  { %v166_v24 = vpop.f32.mrf.mxu0 }
  0xb1   :  { %v167_v25 = vadd.f32 %v482_v23, %v166_v24 }
  0xb3   :  { %v170_v26 = vpack.c.bf16 %v167_v25, %v167_v25 }
  0xb5   :  { %247 = vmatmul.bf16.vlgmr.msra.gmra.mxu1 %v170_v26 }
  0xb8   :  { %v168_v27 = vpop.f32.mrf.mxu0 }
 0x132   :  { %v248_v31 = vpop.f32.mrf.mxu1 }
 0x133   :  { %v249_v32 = vadd.f32 %v483_v30, %v248_v31 }
 0x135   :  { %v252_v33 = vmax.f32 %v249_v32, 0.0 }
 0x137   :  { %v253_v34 = vpack.c.bf16 %v252_v33, %v252_v33 }
 0x139   :  { %330 = vmatmul.bf16.vlgmr.msra.gmra.mxu2 %v253_v34 }
 0x13a   :  { %v250_v35 = vpop.f32.mrf.mxu1 }
 0x1bc   :  { %v331_v37 = vpop.f32.mrf.mxu2 }
 0x1bd   :  { %v332_v38 = vadd.f32 %v484_v36, %v331_v37 }
 0x1bf   :  { %335 = vst [vmem:[#allocation10] sm:$0xff] %v332_v38 }
 0x1c0   :  { %346 = dma.vmem_to_hbm [thread:$0]  %s342_s25, 128, %s344_s28, [#allocation4]  }
 0x1c4   :  { %v333_v39 = vpop.f32.mrf.mxu2 }
 0x1c5   :  { %611 = dma.done.wait [#allocation4], 128  }
 0x1c6   :  { %612 = vsyncadd [#allocation4], 4294967168 }
 0x1c7   :  { %351 = vsyncpa [#allocation3], 1 }
 0x1c8   :  { %352 = vsyncpa [#allocation6], 1 }
 0x1c9   :  { %353 = vsyncpa [#allocation9], 1 }
 0x1ca   :  { %354 = vsyncpa [#allocation4], 1 }

// kernel: tpu_custom_call.1
= control target key start
LH: loop header
LB: loop body
LE: loop exit
PB: predicated region body
PF: predicated region fallthrough
CT: control target
= control target key end

     0   :  { %12 = vsyncpa [#allocation3], 0  ;;  %s684_s0 = inlined_call_operand.hbm [shape: bf16[8,128], index: 0, kind: input, shape index: {}]   ;;  %s685_s1 = inlined_call_operand.hbm [shape: bf16[128,128], index: 1, kind: input, shape index: {}]   ;;  %s686_s2 = inlined_call_operand.vmem [shape: f32[1,128], index: 2, kind: input, shape index: {}]   ;;  %s687_s3 = inlined_call_operand.hbm [shape: bf16[128,128], index: 3, kind: input, shape index: {}]   ;;  %s688_s4 = inlined_call_operand.vmem [shape: f32[1,128], index: 4, kind: input, shape index: {}]   ;;  %s689_s5 = inlined_call_operand.hbm [shape: bf16[128,128], index: 5, kind: input, shape index: {}]   ;;  %s690_s6 = inlined_call_operand.vmem [shape: f32[1,128], index: 6, kind: input, shape index: {}]   ;;  %s691_s7 = inlined_call_operand.hbm [shape: f32[8,128], index: 7, kind: output, shape index: {}]  }
   0x1   :  { %13 = vsyncpa [#allocation6], 0 }
   0x2   :  { %14 = vsyncpa [#allocation9], 0  ;;  %s31_s26 = sshll.u32 %s685_s1, 4  ;;  %s32_s26 = int_to_ptr.hbm [resolvable:$true] %s31_s26 }
   0x3   :  { %15 = vsyncpa [#allocation4], 0  ;;  %s613_s27 = smov [#allocation5]   ;;  %s21_s8 = sshll.u32 %s684_s0, 4  ;;  %s22_s8 = int_to_ptr.hbm [resolvable:$true] %s21_s8 }
   0x4   :  { %s33_s28 = sshll.u32 %s613_s27, 4  ;;  %s614_s9 = smov 64   ;;  %s34_s28 = int_to_ptr.vmem [resolvable:$true] %s33_s28 }
   0x5   :  { %s615_s10 = smov 4   ;;  %s616_s11 = smov [#allocation2]  }
   0x6   :  { %39 = dma.hbm_to_vmem [thread:$0]  %s32_s26, 1024, %s34_s28, [#allocation6], %s614_s9, %s614_s9, %s615_s10  }
   0x7   :  { %s23_s12 = sshll.u32 %s616_s11, 4  ;;  %s46_s15 = sshll.u32 %s687_s3, 4  ;;  %s24_s12 = int_to_ptr.vmem [resolvable:$true] %s23_s12  ;;  %s47_s15 = int_to_ptr.hbm [resolvable:$true] %s46_s15 }
   0x8   :  { %26 = dma.hbm_to_vmem [thread:$0]  %s22_s8, 64, %s24_s12, [#allocation3]  }
   0x9   :  { %s61_s17 = sshll.u32 %s689_s5, 4  ;;  %s617_s18 = smov [#allocation7]   ;;  %s62_s17 = int_to_ptr.hbm [resolvable:$true] %s61_s17 }
   0xa   :  { %s48_s19 = sshll.u32 %s617_s18, 4  ;;  %s618_s0 = smov [#allocation8]   ;;  %s49_s19 = int_to_ptr.vmem [resolvable:$true] %s48_s19 }
   0xb   :  { %54 = dma.hbm_to_vmem [thread:$0]  %s47_s15, 1024, %s49_s19, [#allocation6], %s614_s9, %s614_s9, %s615_s10  }
   0xc   :  { %s63_s20 = sshll.u32 %s618_s0, 4  ;;  %s64_s20 = int_to_ptr.vmem [resolvable:$true] %s63_s20 }
   0xd   :  { %69 = dma.hbm_to_vmem [thread:$0]  %s62_s17, 1024, %s64_s20, [#allocation9], %s614_s9, %s614_s9, %s615_s10  }
   0xe   :  { %605 = dma.done.wait [#allocation3], 64  }
   0xf   :  { %606 = vsyncadd [#allocation3], 4294967232 }
  0x10   :  { %607 = dma.done.wait [#allocation6], 2048  }
  0x11   :  { %608 = vsyncadd [#allocation6], 4294965248 }
  0x12   :  { %609 = dma.done.wait [#allocation9], 1024  }
  0x13   :  { %610 = vsyncadd [#allocation9], 4294966272  ;;  %v458_v0 = vld [vmem:[#allocation5 + $0x38] sm:$0xff]  ;;  %v457_v1 = vld [vmem:[#allocation5 + $0x30] sm:$0xff]  ;;  %s619_s24 = smov [#allocation10]   ;;  %s343_s28 = sshll.u32 %s691_s7, 4  ;;  %s344_s28 = int_to_ptr.hbm [resolvable:$true] %s343_s28 }
  0x14   :  { %157 = vmatpush.bf16.msra.mxu0 %v458_v0  ;;  %v466_v2 = vld [vmem:[#allocation7 + $0x38] sm:$0xff]  ;;  %v465_v3 = vld [vmem:[#allocation7 + $0x30] sm:$0xff]  ;;  %v456_v4 = vld [vmem:[#allocation5 + $0x28] sm:$0xff]  ;;  %s341_s25 = sshll.u32 %s619_s24, 4  ;;  %s342_s25 = int_to_ptr.vmem [resolvable:$true] %s341_s25 }
  0x15   :  { %239 = vmatpush.bf16.msra.mxu1 %v466_v2  ;;  %v464_v5 = vld [vmem:[#allocation7 + $0x28] sm:$0xff]  ;;  %v455_v6 = vld [vmem:[#allocation5 + $0x20] sm:$0xff]  ;;  %v454_v8 = vld [vmem:[#allocation5 + $0x18] sm:$0xff] }
  0x16   :  { %v463_v7 = vld [vmem:[#allocation7 + $0x20] sm:$0xff]  ;;  %v462_v9 = vld [vmem:[#allocation7 + $0x18] sm:$0xff]  ;;  %v453_v10 = vld [vmem:[#allocation5 + $0x10] sm:$0xff] }
  0x17   :  { %v461_v11 = vld [vmem:[#allocation7 + $0x10] sm:$0xff]  ;;  %v452_v12 = vld [vmem:[#allocation5 + $0x8] sm:$0xff]  ;;  %v451_v14 = vld [vmem:[#allocation5] sm:$0xff] }
  0x18   :  { %158 = vmatpush.bf16.msra.mxu0 %v457_v1  ;;  %v460_v13 = vld [vmem:[#allocation7 + $0x8] sm:$0xff]  ;;  %v88_v15 = vld [vmem:[#allocation2] sm:$0xf]  ;;  %v459_v16 = vld [vmem:[#allocation7] sm:$0xff] }
  0x19   :  { %240 = vmatpush.bf16.msra.mxu1 %v465_v3  ;;  %v474_v17 = vld [vmem:[#allocation8 + $0x38] sm:$0xff]  ;;  %v473_v18 = vld [vmem:[#allocation8 + $0x30] sm:$0xff]  ;;  %v472_v19 = vld [vmem:[#allocation8 + $0x28] sm:$0xff] }
  0x1a   :  { %322 = vmatpush.bf16.msra.mxu2 %v474_v17  ;;  %v471_v20 = vld [vmem:[#allocation8 + $0x20] sm:$0xff]  ;;  %v470_v21 = vld [vmem:[#allocation8 + $0x18] sm:$0xff]  ;;  %v469_v22 = vld [vmem:[#allocation8 + $0x10] sm:$0xff] }
  0x1b   :  { %v482_v23 = vld [vmem:[%s686_s2] ss:$0 sm:$0xff]  ;;  %v468_v28 = vld [vmem:[#allocation8 + $0x8] sm:$0xff]  ;;  %v467_v29 = vld [vmem:[#allocation8] sm:$0xff] }
  0x1c   :  { %159 = vmatpush.bf16.msra.mxu0 %v456_v4  ;;  %v483_v30 = vld [vmem:[%s688_s4] ss:$0 sm:$0xff] }
  0x1d   :  { %241 = vmatpush.bf16.msra.mxu1 %v464_v5  ;;  %v484_v36 = vld [vmem:[%s690_s6] ss:$0 sm:$0xff] }
  0x1e   :  { %323 = vmatpush.bf16.msra.mxu2 %v473_v18 }
  0x20   :  { %160 = vmatpush.bf16.msra.mxu0 %v455_v6 }
  0x21   :  { %242 = vmatpush.bf16.msra.mxu1 %v463_v7 }
  0x22   :  { %324 = vmatpush.bf16.msra.mxu2 %v472_v19 }
  0x24   :  { %161 = vmatpush.bf16.msra.mxu0 %v454_v8 }
  0x25   :  { %243 = vmatpush.bf16.msra.mxu1 %v462_v9 }
  0x26   :  { %325 = vmatpush.bf16.msra.mxu2 %v471_v20 }
  0x28   :  { %162 = vmatpush.bf16.msra.mxu0 %v453_v10 }
  0x29   :  { %244 = vmatpush.bf16.msra.mxu1 %v461_v11 }
  0x2a   :  { %326 = vmatpush.bf16.msra.mxu2 %v470_v21 }
  0x2c   :  { %163 = vmatpush.bf16.msra.mxu0 %v452_v12 }
  0x2d   :  { %245 = vmatpush.bf16.msra.mxu1 %v460_v13 }
  0x2e   :  { %327 = vmatpush.bf16.msra.mxu2 %v469_v22 }
  0x30   :  { %164 = vmatpush.bf16.msra.mxu0 %v451_v14 }
  0x31   :  { %246 = vmatpush.bf16.msra.mxu1 %v459_v16 }
  0x32   :  { %328 = vmatpush.bf16.msra.mxu2 %v468_v28 }
  0x33   :  { %165 = vmatmul.bf16.vlgmr.msra.gmra.mxu0 %v88_v15 }
  0x36   :  { %329 = vmatpush.bf16.msra.mxu2 %v467_v29 }
  0xb0   :  { %v166_v24 = vpop.f32.mrf.mxu0 }
  0xb1   :  { %v167_v25 = vadd.f32 %v482_v23, %v166_v24 }
  0xb3   :  { %v170_v26 = vpack.c.bf16 %v167_v25, %v167_v25 }
  0xb5   :  { %247 = vmatmul.bf16.vlgmr.msra.gmra.mxu1 %v170_v26 }
  0xb8   :  { %v168_v27 = vpop.f32.mrf.mxu0 }
 0x132   :  { %v248_v31 = vpop.f32.mrf.mxu1 }
 0x133   :  { %v249_v32 = vadd.f32 %v483_v30, %v248_v31 }
 0x135   :  { %v252_v33 = vmax.f32 %v249_v32, 0.0 }
 0x137   :  { %v253_v34 = vpack.c.bf16 %v252_v33, %v252_v33 }
 0x139   :  { %330 = vmatmul.bf16.vlgmr.msra.gmra.mxu2 %v253_v34 }
 0x13a   :  { %v250_v35 = vpop.f32.mrf.mxu1 }
 0x1bc   :  { %v331_v37 = vpop.f32.mrf.mxu2 }
 0x1bd   :  { %v332_v38 = vadd.f32 %v484_v36, %v331_v37 }
 0x1bf   :  { %335 = vst [vmem:[#allocation10] sm:$0xff] %v332_v38 }
 0x1c0   :  { %346 = dma.vmem_to_hbm [thread:$0]  %s342_s25, 128, %s344_s28, [#allocation4]  }
 0x1c4   :  { %v333_v39 = vpop.f32.mrf.mxu2 }
 0x1c5   :  { %611 = dma.done.wait [#allocation4], 128  }
 0x1c6   :  { %612 = vsyncadd [#allocation4], 4294967168 }
 0x1c7   :  { %351 = vsyncpa [#allocation3], 1 }
 0x1c8   :  { %352 = vsyncpa [#allocation6], 1 }
 0x1c9   :  { %353 = vsyncpa [#allocation9], 1 }
 0x1ca   :  { %354 = vsyncpa [#allocation4], 1 }

</bundles_post_ra>
